<compile_context>
chip_gen: v7x
topology: tpu7x:2x2x1
jax: 0.10.0
libtpu: 0.0.40
codegen_flags: <defaults>
</compile_context>

<pallas_src>
import functools

import jax
import jax.numpy as jnp
import numpy as np
from jax.experimental import pallas as pl
from jax.experimental.pallas import tpu as pltpu


def _round_up(x, m):
    return ((x + m - 1) // m) * m


# ---------------------------------------------------------------------------
# Kernel 1 (hot loop): z = spliced @ W^T + b streamed over (cell tiles, K
# tiles); emits per-cell-tile, per-target-gene sums of sigmoid'(z)^2.
# ---------------------------------------------------------------------------
def _dcol_kernel(s_ref, wt_ref, b_ref, dcol_ref, z_acc, *,
                 tm, nc_tiles, last_valid):
    """Grid = (cell_tiles, k_tiles); k (regulator genes) is the reduction axis.

    s_ref  : (TM, TK) bf16  spliced tile (cells x regulator genes)
    wt_ref : (TK, G)  bf16  W^T row tile (regulator genes x target genes)
    b_ref  : (1,  G)  f32   bias (resident)
    dcol_ref: (8, G)  f32   output block for this cell tile; row 0 holds
                            sum_{c in tile} sigmoid'(z_c)^2 per target gene.
    z_acc  : (TM, G)  f32   VMEM accumulator for the matmul.
    """
    ci = pl.program_id(0)
    ki = pl.program_id(1)
    nk = pl.num_programs(1)

    @pl.when(ki == 0)
    def _():
        z_acc[...] = jnp.zeros_like(z_acc)

    # MXU partial product: bf16 operands, f32 accumulation, no in-kernel casts.
    z_acc[...] += jnp.dot(s_ref[...], wt_ref[...],
                          preferred_element_type=jnp.float32)

    @pl.when(ki == nk - 1)
    def _():
        z = z_acc[...] + b_ref[...]
        sig = jax.nn.sigmoid(z)
        d = sig * (1.0 - sig)
        d2 = d * d

        def _write(vals):
            row = jnp.sum(vals, axis=0, keepdims=True)          # (1, G)
            dcol_ref[...] = jnp.broadcast_to(row, dcol_ref.shape)

        if last_valid is None:
            _write(d2)
        else:
            # Padded cells live only in the last cell tile -> mask only there.
            @pl.when(ci == nc_tiles - 1)
            def _():
                rows = jax.lax.broadcasted_iota(jnp.int32, (tm, 1), 0)
                valid = (rows < last_valid).astype(jnp.float32)
                _write(d2 * valid)

            @pl.when(ci != nc_tiles - 1)
            def _():
                _write(d2)


# ---------------------------------------------------------------------------
# Kernel 2 (one-shot): f32 W statistics streamed once over W^T row tiles.
#   absw_ref[0, i] = sum_j |W[i, j]|
#   wsq_ref [0, i] = sum_j  W[i, j]^2
#   viol_ref[0, i] = sum_j |W[i, j]| * |1 - mask[i, j]|     (only if has_mask)
# Cross-lane totals are done outside in XLA.
# ---------------------------------------------------------------------------
def _w_stats_kernel(wt_ref, *rest, has_mask):
    if has_mask:
        m_ref, absw_ref, wsq_ref, viol_ref = rest
    else:
        m_ref = None
        absw_ref, wsq_ref = rest
        viol_ref = None

    ki = pl.program_id(0)

    @pl.when(ki == 0)
    def _():
        absw_ref[...] = jnp.zeros_like(absw_ref)
        wsq_ref[...] = jnp.zeros_like(wsq_ref)
        if has_mask:
            viol_ref[...] = jnp.zeros_like(viol_ref)

    wt = wt_ref[...]                                    # (TKW, G) f32
    absw = jnp.abs(wt)
    absw_ref[...] += jnp.sum(absw, axis=0, keepdims=True)
    wsq_ref[...] += jnp.sum(wt * wt, axis=0, keepdims=True)
    if has_mask:
        # |W * (1 - mask)| == |W| * |1 - mask| exactly, for any mask values.
        viol_ref[...] += jnp.sum(absw * jnp.abs(1.0 - m_ref[...]),
                                 axis=0, keepdims=True)


def regulatory_network_loss(spliced, W, bias, atac_mask=None, *,
                            sparsity_weight=1.0, jacobian_weight=0.1,
                            atac_violation_weight=10.0, soft_constraint=True,
                            tile_m=None, tile_k=None):
    """JAX/Pallas equivalent of RegulatoryNetworkLoss.forward. Returns a dict."""
    n_cells, n_genes = spliced.shape

    # --- tile sizes --------------------------------------------------------
    G = _round_up(n_genes, 128)                     # target genes on 128 lanes
    if tile_k is not None:
        TK = int(tile_k)
        if TK % 128 != 0:
            raise ValueError("tile_k must be a multiple of 128")
        G = _round_up(G, TK)                        # always divides now
    else:
        TK = 256 if G % 256 == 0 else 128

    if tile_m is not None:
        TM = int(_round_up(tile_m, 8))
    else:
        # Big cell tiles amortize the W^T HBM stream (re-fetched once per cell
        # tile); shrink to fit the default scoped-VMEM budget on all chips
        # (v7x has only 64 MiB physical / 32 MiB default scoped VMEM).
        TM = min(512, _round_up(n_cells, 8))
        budget = 28 * 1024 * 1024

        def vmem_est(tm):
            return (2 * tm * TK * 2          # spliced bf16, double-buffered
                    + 2 * TK * G * 2         # W^T bf16, double-buffered
                    + 2 * G * 4              # bias
                    + tm * G * 4             # z accumulator scratch
                    + 2 * 8 * G * 4)         # dcol output block

        while vmem_est(TM) > budget and TM > 64:
            TM = max(64, _round_up(TM // 2, 8))
        # TODO(synk): for very large gene counts (G >~ 16k) the (TK, G) W^T row
        # tile itself exceeds scoped VMEM; a target-gene (lane) grid axis would
        # be needed in that regime.

    padded_cells = _round_up(n_cells, TM)
    nc_tiles = padded_cells // TM
    nk_tiles = G // TK
    last_valid = (None if padded_cells == n_cells
                  else n_cells - (nc_tiles - 1) * TM)

    include_atac = (atac_mask is not None) and soft_constraint

    # --- host-side layout: genes on lanes, W pre-transposed ----------------
    # bf16 W^T feeds the MXU hot loop; an f32 copy feeds the one-shot stats
    # pass (full precision for the L1 / L2 / ATAC reductions).  Padded rows and
    # columns are zero, so they contribute nothing to any reduction.
    w_t32 = jnp.zeros((G, G), jnp.float32)
    w_t32 = w_t32.at[:n_genes, :n_genes].set(jnp.asarray(W, jnp.float32).T)
    w_t16 = w_t32.astype(jnp.bfloat16)

    s_p = jnp.zeros((padded_cells, G), jnp.bfloat16)
    s_p = s_p.at[:n_cells, :n_genes].set(spliced.astype(jnp.bfloat16))
    b_p = jnp.zeros((1, G), jnp.float32)
    b_p = b_p.at[0, :n_genes].set(jnp.asarray(bias, jnp.float32).reshape(-1))

    # --- kernel 1: sum_c sigmoid'(z_c)^2 per target gene, per cell tile ----
    dcol_parts = pl.pallas_call(
        functools.partial(_dcol_kernel, tm=TM, nc_tiles=nc_tiles,
                          last_valid=last_valid),
        out_shape=jax.ShapeDtypeStruct((nc_tiles * 8, G), jnp.float32),
        grid_spec=pltpu.PrefetchScalarGridSpec(
            num_scalar_prefetch=0,
            grid=(nc_tiles, nk_tiles),
            in_specs=[
                pl.BlockSpec((TM, TK), lambda ci, ki: (ci, ki)),  # spliced
                pl.BlockSpec((TK, G), lambda ci, ki: (ki, 0)),    # W^T (bf16)
                pl.BlockSpec((1, G), lambda ci, ki: (0, 0)),      # bias
            ],
            out_specs=pl.BlockSpec((8, G), lambda ci, ki: (ci, 0)),
            scratch_shapes=[pltpu.VMEM((TM, G), jnp.float32)],
        ),
        # Cell tiles are independent (per-ci output blocks) -> "parallel" so
        # v7x can shard them across its 2 TensorCores; K is the reduction.
        compiler_params=pltpu.CompilerParams(
            dimension_semantics=("parallel", "arbitrary")),
    )(s_p, w_t16, b_p)

    # --- kernel 2: one-shot f32 W statistics (mask streamed exactly once) --
    TKW = TK
    w_budget = 24 * 1024 * 1024
    n_streams = 2 if include_atac else 1
    while (2 * n_streams * TKW * G * 4 > w_budget and TKW > 8
           and TKW % 2 == 0 and G % (TKW // 2) == 0):
        TKW //= 2

    w_inputs = [w_t32]
    w_in_specs = [pl.BlockSpec((TKW, G), lambda k: (k, 0))]
    w_out_shapes = [jax.ShapeDtypeStruct((1, G), jnp.float32),   # sum|W| cols
                    jax.ShapeDtypeStruct((1, G), jnp.float32)]   # rowsum W^2
    w_out_specs = [pl.BlockSpec((1, G), lambda k: (0, 0)),
                   pl.BlockSpec((1, G), lambda k: (0, 0))]
    if include_atac:
        m_t = jnp.zeros((G, G), jnp.float32)
        m_t = m_t.at[:n_genes, :n_genes].set(
            jnp.asarray(atac_mask, jnp.float32).T)
        w_inputs.append(m_t)
        w_in_specs.append(pl.BlockSpec((TKW, G), lambda k: (k, 0)))
        w_out_shapes.append(jax.ShapeDtypeStruct((1, G), jnp.float32))
        w_out_specs.append(pl.BlockSpec((1, G), lambda k: (0, 0)))

    w_stats = pl.pallas_call(
        functools.partial(_w_stats_kernel, has_mask=include_atac),
        out_shape=tuple(w_out_shapes),
        grid_spec=pltpu.PrefetchScalarGridSpec(
            num_scalar_prefetch=0,
            grid=(G // TKW,),
            in_specs=w_in_specs,
            out_specs=tuple(w_out_specs),
        ),
        compiler_params=pltpu.CompilerParams(
            dimension_semantics=("arbitrary",)),
    )(*w_inputs)

    if include_atac:
        absw_row, wsq_row, viol_row = w_stats
    else:
        absw_row, wsq_row = w_stats
        viol_row = None

    # --- tiny XLA epilogue --------------------------------------------------
    dcol_total = dcol_parts.reshape(nc_tiles, 8, G)[:, 0, :].sum(axis=0)  # (G,)
    jac_raw = jnp.sum(dcol_total * wsq_row[0])

    losses = {}
    losses["sparsity"] = (sparsity_weight * jnp.sum(absw_row)
                          / float(n_genes * n_genes))
    losses["jacobian"] = jacobian_weight * jac_raw / float(n_cells)
    if include_atac:
        losses["atac_violation"] = atac_violation_weight * jnp.sum(viol_row)
    else:
        losses["atac_violation"] = jnp.float32(0.0)
    losses["total"] = (losses["sparsity"] + losses["jacobian"]
                       + losses["atac_violation"])
    return losses


def _reference(spliced, W, bias, atac_mask, *, sparsity_weight=1.0,
               jacobian_weight=0.1, atac_violation_weight=10.0):
    """Pure-JAX reference (explicit per-cell Jacobian, all f32)."""
    z = spliced @ W.T + bias
    sig = jax.nn.sigmoid(z)
    d = sig * (1.0 - sig)
    J = d[:, :, None] * W[None, :, :]                     # (N, G, G)
    jac = jacobian_weight * jnp.mean(jnp.sum(J * J, axis=(1, 2)))
    sparsity = sparsity_weight * jnp.mean(jnp.abs(W))
    if atac_mask is not None:
        atac = atac_violation_weight * jnp.sum(jnp.abs(W * (1.0 - atac_mask)))
    else:
        atac = jnp.float32(0.0)
    return {"sparsity": sparsity, "jacobian": jac, "atac_violation": atac,
            "total": sparsity + jac + atac}


if __name__ == "__main__":
    # Small but non-trivial: exercises gene padding (200 -> 256 lanes), cell
    # padding (160 -> 192 with TM=64, 3 cell tiles) and a 2-step K reduction.
    n_cells, n_genes = 160, 200
    key = jax.random.PRNGKey(0)
    k_w, k_b, k_s, k_m = jax.random.split(key, 4)

    W = 0.1 * jax.random.normal(k_w, (n_genes, n_genes), jnp.float32)
    bias = 0.1 * jax.random.normal(k_b, (n_genes,), jnp.float32)
    spliced = 5.0 * jax.random.uniform(k_s, (n_cells, n_genes), jnp.float32)
    atac_mask = jax.random.bernoulli(k_m, 0.7, (n_genes, n_genes)).astype(
        jnp.float32)

    ref = _reference(spliced, W, bias.reshape(1, n_genes), atac_mask)

    # Masked path, small explicit tiles (cell padding + multi-step K).
    out = regulatory_network_loss(spliced, W, bias, atac_mask,
                                  tile_m=64, tile_k=128)
    out = jax.block_until_ready(out)
    for k in ("sparsity", "jacobian", "atac_violation", "total"):
        np.testing.assert_allclose(np.asarray(out[k]), np.asarray(ref[k]),
                                   rtol=3e-2, atol=1e-4)

    # Mask-free path, default tiles (single cell tile, TK=256, no padding mask).
    out2 = regulatory_network_loss(spliced, W, bias, None)
    out2 = jax.block_until_ready(out2)
    np.testing.assert_allclose(np.asarray(out2["sparsity"]),
                               np.asarray(ref["sparsity"]), rtol=3e-2, atol=1e-4)
    np.testing.assert_allclose(np.asarray(out2["jacobian"]),
                               np.asarray(ref["jacobian"]), rtol=3e-2, atol=1e-4)
    assert float(out2["atac_violation"]) == 0.0

    print("KERNEL_OK")
</pallas_src>

<mosaic_0001>
module attributes {stable_mosaic.version = 11 : i64} {
  func.func @_dcol_kernel(%arg0: i32, %arg1: i32, %arg2: memref<64x128xbf16, #tpu.memory_space<vmem>>, %arg3: memref<128x256xbf16, #tpu.memory_space<vmem>>, %arg4: memref<1x256xf32, #tpu.memory_space<vmem>>, %arg5: memref<8x256xf32, #tpu.memory_space<vmem>>, %arg6: memref<64x256xf32, #tpu.memory_space<vmem>>) attributes {dimension_semantics = [#tpu.dimension_semantics<parallel>, #tpu.dimension_semantics<arbitrary>], iteration_bounds = array<i64: 3, 2>, scalar_prefetch = 0 : i64, scratch_operands = 1 : i64, tpu.core_type = #tpu.core_type<tc>, window_params = [{transform_indices = @transform_0, window_bounds = array<i64: 64, 128>}, {transform_indices = @transform_1, window_bounds = array<i64: 128, 256>}, {pipeline_mode = #tpu.pipeline_mode<synchronous>, transform_indices = @transform_2, window_bounds = array<i64: 1, 256>}, {transform_indices = @transform_3, window_bounds = array<i64: 8, 256>}]} {
    %c0_i32 = arith.constant 0 : i32
    %0 = arith.cmpi eq, %arg1, %c0_i32 : i32
    %1 = arith.extui %0 : i1 to i32
    %c0_i32_0 = arith.constant 0 : i32
    %2 = arith.cmpi ne, %1, %c0_i32_0 : i32
    scf.if %2 {
      %cst_9 = arith.constant 0.000000e+00 : f32
      %12 = vector.broadcast %cst_9 : f32 to vector<64x256xf32>
      %c0_10 = arith.constant 0 : index
      %c0_11 = arith.constant 0 : index
      %13 = vector.load %arg6[%c0_10, %c0_11] : memref<64x256xf32, #tpu.memory_space<vmem>>, vector<64x256xf32>
      tpu.vector_store %arg6[%c0_10, %c0_11], %12 {strides = array<i32>} : memref<64x256xf32, #tpu.memory_space<vmem>>, vector<64x256xf32>,
    } else {
    }
    %c0 = arith.constant 0 : index
    %c0_1 = arith.constant 0 : index
    %3 = vector.load %arg6[%c0, %c0_1] : memref<64x256xf32, #tpu.memory_space<vmem>>, vector<64x256xf32>
    %c0_2 = arith.constant 0 : index
    %c0_3 = arith.constant 0 : index
    %4 = vector.load %arg2[%c0_2, %c0_3] : memref<64x128xbf16, #tpu.memory_space<vmem>>, vector<64x128xbf16>
    %c0_4 = arith.constant 0 : index
    %c0_5 = arith.constant 0 : index
    %5 = vector.load %arg3[%c0_4, %c0_5] : memref<128x256xbf16, #tpu.memory_space<vmem>>, vector<128x256xbf16>
    %cst = arith.constant dense<0.000000e+00> : vector<64x256xf32>
    %6 = tpu.matmul %4, %5, %cst {dimension_numbers = #tpu.dot_dimension_numbers<[1], [0], [0], [1], [0, 0, 1, 1], [], []>} : vector<64x128xbf16>, vector<128x256xbf16>, vector<64x256xf32> -> vector<64x256xf32>
    %7 = arith.addf %3, %6 : vector<64x256xf32>
    %c0_6 = arith.constant 0 : index
    %c0_7 = arith.constant 0 : index
    %8 = vector.load %arg6[%c0_6, %c0_7] : memref<64x256xf32, #tpu.memory_space<vmem>>, vector<64x256xf32>
    tpu.vector_store %arg6[%c0_6, %c0_7], %7 {strides = array<i32>} : memref<64x256xf32, #tpu.memory_space<vmem>>, vector<64x256xf32>,
    %c1_i32 = arith.constant 1 : i32
    %9 = arith.cmpi eq, %arg1, %c1_i32 : i32
    %10 = arith.extui %9 : i1 to i32
    %c0_i32_8 = arith.constant 0 : i32
    %11 = arith.cmpi ne, %10, %c0_i32_8 : i32
    scf.if %11 {
      %c0_9 = arith.constant 0 : index
      %c0_10 = arith.constant 0 : index
      %12 = vector.load %arg6[%c0_9, %c0_10] : memref<64x256xf32, #tpu.memory_space<vmem>>, vector<64x256xf32>
      %c0_11 = arith.constant 0 : index
      %c0_12 = arith.constant 0 : index
      %13 = vector.load %arg4[%c0_11, %c0_12] : memref<1x256xf32, #tpu.memory_space<vmem>>, vector<1x256xf32>
      %14 = vector.broadcast %13 : vector<1x256xf32> to vector<64x256xf32>
      %15 = arith.addf %12, %14 : vector<64x256xf32>
      %16 = arith.negf %15 : vector<64x256xf32>
      %17 = math.exp %16 : vector<64x256xf32>
      %cst_13 = arith.constant 1.000000e+00 : f32
      %18 = vector.broadcast %cst_13 : f32 to vector<64x256xf32>
      %19 = arith.addf %18, %17 : vector<64x256xf32>
      %20 = arith.divf %18, %19 : vector<64x256xf32>
      %cst_14 = arith.constant 1.000000e+00 : f32
      %21 = vector.broadcast %cst_14 : f32 to vector<64x256xf32>
      %22 = arith.subf %21, %20 : vector<64x256xf32>
      %23 = arith.mulf %20, %22 : vector<64x256xf32>
      %24 = arith.mulf %23, %23 : vector<64x256xf32>
      %c2_i32 = arith.constant 2 : i32
      %25 = arith.cmpi eq, %arg0, %c2_i32 : i32
      %26 = arith.extui %25 : i1 to i32
      %c0_i32_15 = arith.constant 0 : i32
      %27 = arith.cmpi ne, %26, %c0_i32_15 : i32
      scf.if %27 {
        %31 = tpu.iota {dimensions = array<i32: 0>} : vector<64x1xi32>
        %c32_i32 = arith.constant 32 : i32
        %32 = vector.broadcast %c32_i32 : i32 to vector<64x1xi32>
        %33 = arith.cmpi slt, %31, %32 : vector<64x1xi32>
        %34 = arith.extui %33 : vector<64x1xi1> to vector<64x1xi32>
        %35 = arith.sitofp %34 : vector<64x1xi32> to vector<64x1xf32>
        %36 = vector.broadcast %35 : vector<64x1xf32> to vector<64x256xf32>
        %37 = arith.mulf %24, %36 : vector<64x256xf32>
        %cst_18 = arith.constant dense<0.000000e+00> : vector<256xf32>
        %38 = vector.multi_reduction <add>, %37, %cst_18 [0] : vector<64x256xf32> to vector<256xf32>
        %39 = vector.shape_cast %38 : vector<256xf32> to vector<1x256xf32>
        %40 = vector.shape_cast %39 : vector<1x256xf32> to vector<1x256xf32>
        %41 = vector.broadcast %40 : vector<1x256xf32> to vector<8x256xf32>
        %c0_19 = arith.constant 0 : index
        %c0_20 = arith.constant 0 : index
        %42 = vector.load %arg5[%c0_19, %c0_20] : memref<8x256xf32, #tpu.memory_space<vmem>>, vector<8x256xf32>
        tpu.vector_store %arg5[%c0_19, %c0_20], %41 {strides = array<i32>} : memref<8x256xf32, #tpu.memory_space<vmem>>, vector<8x256xf32>,
      } else {
      }
      %c2_i32_16 = arith.constant 2 : i32
      %28 = arith.cmpi ne, %arg0, %c2_i32_16 : i32
      %29 = arith.extui %28 : i1 to i32
      %c0_i32_17 = arith.constant 0 : i32
      %30 = arith.cmpi ne, %29, %c0_i32_17 : i32
      scf.if %30 {
        %cst_18 = arith.constant dense<0.000000e+00> : vector<256xf32>
        %31 = vector.multi_reduction <add>, %24, %cst_18 [0] : vector<64x256xf32> to vector<256xf32>
        %32 = vector.shape_cast %31 : vector<256xf32> to vector<1x256xf32>
        %33 = vector.shape_cast %32 : vector<1x256xf32> to vector<1x256xf32>
        %34 = vector.broadcast %33 : vector<1x256xf32> to vector<8x256xf32>
        %c0_19 = arith.constant 0 : index
        %c0_20 = arith.constant 0 : index
        %35 = vector.load %arg5[%c0_19, %c0_20] : memref<8x256xf32, #tpu.memory_space<vmem>>, vector<8x256xf32>
        tpu.vector_store %arg5[%c0_19, %c0_20], %34 {strides = array<i32>} : memref<8x256xf32, #tpu.memory_space<vmem>>, vector<8x256xf32>,
      } else {
      }
    } else {
    }
    return
  }
  func.func @transform_0(%arg0: i32, %arg1: i32) -> (i32, i32) {
    %c0_i32 = arith.constant 0 : i32
    return %arg0, %arg1 : i32, i32
  }
  func.func @transform_1(%arg0: i32, %arg1: i32) -> (i32, i32) {
    %c0_i32 = arith.constant 0 : i32
    %c0_i32_0 = arith.constant 0 : i32
    return %arg1, %c0_i32 : i32, i32
  }
  func.func @transform_2(%arg0: i32, %arg1: i32) -> (i32, i32) {
    %c0_i32 = arith.constant 0 : i32
    %c0_i32_0 = arith.constant 0 : i32
    %c0_i32_1 = arith.constant 0 : i32
    return %c0_i32, %c0_i32_0 : i32, i32
  }
  func.func @transform_3(%arg0: i32, %arg1: i32) -> (i32, i32) {
    %c0_i32 = arith.constant 0 : i32
    %c0_i32_0 = arith.constant 0 : i32
    return %arg0, %c0_i32 : i32, i32
  }
}

</mosaic_0001>

<bundles_post_ra>
// kernel: tpu_custom_call.1
= control target key start
LH: loop header
LB: loop body
LE: loop exit
PB: predicated region body
PF: predicated region fallthrough
CT: control target
= control target key end

     0   :  { %s1903_s0 = inlined_call_operand.hbm [shape: bf16[192,256], index: 0, kind: input, shape index: {}]   ;;  %s1904_s1 = inlined_call_operand.hbm [shape: bf16[256,256], index: 1, kind: input, shape index: {}]   ;;  %s1905_s2 = inlined_call_operand.vmem [shape: f32[1,256], index: 2, kind: input, shape index: {}]   ;;  %s1906_s3 = inlined_call_operand.hbm [shape: f32[24,256], index: 3, kind: output, shape index: {}]  }
   0x1   :  { %1917 = sst [smem:[#allocation17_spill]] %s1903_s0 }
   0x2   :  { %1918 = sst [smem:[#allocation18_spill]] %s1904_s1 }
   0x3   :  { %1919 = sst [smem:[#allocation19_spill]] %s1905_s2 }
   0x4   :  { %1920 = sst [smem:[#allocation20_spill]] %s1906_s3 }
   0x5   :  { %8 = vsyncpa [#allocation4], 0 }
   0x6   :  { %10 = vsyncpa [#allocation4 + $0x1], 0 }
   0x7   :  { %11 = vsyncpa [#allocation7], 0 }
   0x8   :  { %13 = vsyncpa [#allocation7 + $0x1], 0 }
   0x9   :  { %14 = vsyncpa [#allocation5], 0 }
   0xa   :  { %16 = vsyncpa [#allocation5 + $0x1], 0  ;;  %s1495_s12 = smov 0   ;;  %s1497_s13 = smov 0  }
   0xb   :  { %s1499_s14 = smov 0   ;;  %s1501_s15 = smov 0  }
   0xc   :  { %s1503_s16 = smov 0   ;;  %s1505_s17 = smov 0  }
   0xd   :  { %s1507_s18 = smov 0   ;;  %s1509_s19 = smov 0  }
   0xe   :  { %s1511_s20 = smov 0   ;;  %s1513_s21 = smov 0  }
   0xf   :  { %s1515_s22 = smov 0   ;;  %s1517_s23 = smov 0  }
  0x10   :  { %s1519_s24 = smov 0   ;;  %s1521_s25 = smov 0  }
  0x11 LB: > { %1921 = sst [smem:[#allocation12_spill]] %s1412_s12  ;;  %s31_s26 = sadd.s32 1, %s1456_s23  ;;  %s1464_s25 = sphi %s1521_s25, %s22_s25   ;;  %s1460_s24 = sphi %s1519_s24, %s1969_s24   ;;  %s1456_s23 = sphi %s1517_s23, %s1968_s23   ;;  %s1452_s22 = sphi %s1515_s22, %s1967_s22   ;;  %s1448_s21 = sphi %s1513_s21, %s1966_s21   ;;  %s1444_s20 = sphi %s1511_s20, %s1965_s20   ;;  %s1440_s19 = sphi %s1509_s19, %s1964_s19   ;;  %s1436_s18 = sphi %s1507_s18, %s1963_s18   ;;  %s1432_s17 = sphi %s1505_s17, %s1962_s17   ;;  %s1428_s16 = sphi %s1503_s16, %s1961_s16   ;;  %s1424_s15 = sphi %s1501_s15, %s1960_s15   ;;  %s1420_s14 = sphi %s1499_s14, %s1959_s14   ;;  %s1416_s13 = sphi %s1497_s13, %s1958_s13   ;;  %s1412_s12 = sphi %s1495_s12, %s1957_s12  }
  0x12   : > { %1922 = sst [smem:[#allocation13_spill]] %s1448_s21  ;;  %s34_s27 = sadd.s32 1, %s1460_s24 }
  0x13   : > { %1923 = sst [smem:[#allocation14_spill]] %s1452_s22  ;;  %p32_p0 = scmp.ge.s32.totalorder %s31_s26, 2 }
  0x14   : > { %s43_s28 = sadd.s32 1, %s1444_s20  ;;  %p50_p1 = scmp.ne.s32.totalorder %s1444_s20, %s1440_s19 }
  0x15   : > { %p1911_p2 = scmp.eq.s32.totalorder %s1464_s25, 0  ;;  %s1971_s26 = smov (%p32_p0, %s31_s26), 0 }
  0x16   : > { %1924 = sst [smem:[#allocation15_spill]] %s1971_s26  ;;  %s1973_s27 = smov (!%p32_p0, %s34_s27), %s1460_s24 }
  0x17   : > { %s1576_s29 = ssub.s32 %s1456_s23, %s1971_s26  ;;  %p1580_p3 = por %p1911_p2, %p50_p1 }
  0x18   : > { %p36_p4 = scmp.ge.s32.totalorder %s1973_s27, 3  ;;  %s116_s4 = sadd.s32 1, %s1420_s14 }
  0x19   : > { %p1910_p7 = scmp.lt.s32.totalorder %s1464_s25, 6  ;;  %s156_s6 = sand.u32 1, %s1444_s20  }
  0x1a   : > { %s1975_s27 = smov (%p36_p4, %s1973_s27), 0  ;;  %s948_s10 = sshll.u32 %s156_s6, 5 }
  0x1b   : > { %1926 = sst [smem:[#allocation16_spill]] %s1975_s27  ;;  %s38_s5 = ssub.s32 %s1460_s24, %s1975_s27 }
  0x1c   : > { %s40_s7 = sor.u32 %s1576_s29, %s38_s5  ;;  %p114_p8 = scmp.eq.s32.totalorder %s38_s5, 0 }
  0x1d   : > { %p41_p9 = scmp.eq.s32.totalorder %s40_s7, 0  ;;  %s1005_s11 = sshll.u32 %s1460_s24, 4 }
  0x1e   : > { %s1596_s8 = scalar_select %p114_p8, %s1420_s14, %s116_s4  }
  0x1f   : > { %s1599_s9 = scalar_select %p41_p9, %s1444_s20, %s43_s28  }
  0x20   : > { %s166_s26 = sadd.s32 %s1456_s23, %s1005_s11  ;;  %s160_s22 = scalar_lea.vmem [#allocation3], %s948_s10 }
  0x21   : > { %s951_s3 = sshll.u32 %s166_s26, 6  ;;  %s169_s2 = sshll.u32 %s160_s22, 4  ;;  %s1608_s2 = int_to_ptr.vmem [resolvable:$true] %s169_s2 }
  0x22   : > { %s1927_s0 = sld [smem:[#allocation17_spill]]  ;;  %p1614_p10 = pnand %p1910_p7, %p1580_p3 }
  0x23   : > { %p956_p11 = scmp.ge.s32.totalorder %s1464_s25, 1  ;;  %s1619_s22 = scalar_lea.sflag [#allocation4], %s156_s6 }
  0x24   : > { %p1256_p13 = pneg %p1614_p10 }
  0x28   : > { %s1606_s12 = scalar_lea.hbm %s1927_s0, %s951_s3  ;;  %s1259_s26 = scalar_lea.hbm %s1927_s0, 3072 }
  0x29   : > { %s1254_s1 = scalar_lea.hbm %s1606_s12, 512  ;;  %p1260_p3 = scmp.lt.u32.totalorder %s1606_s12, %s1927_s0 }
  0x2a   : > { %p1255_p12 = scmp.ne.s32.totalorder %s1606_s12, %s1254_s1  ;;  %p1261_p4 = scmp.lt.u32.totalorder %s1259_s26, %s1254_s1 }
  0x2b   : > { %p1263_p9 = scmp.lt.u32.totalorder %s1254_s1, %s1606_s12 }
  0x2c   : > { %p1257_p0 = pnand %p1256_p13, %p1255_p12  ;;  %p1262_p8 = por %p1261_p4, %p1260_p3 }
  0x2e   : > { %p1258_p1 = pneg %p1257_p0  ;;  %p1264_p7 = por %p1263_p9, %p1262_p8 }
  0x30   : > { %p1265_p2 = pnand %p1264_p7, %p1258_p1 }
  0x32   : > { %1268 = shalt.err (!%p1265_p2)
}
  0x33   : > { %s1269_s5 = scalar_lea.vmem %s1608_s2, 512  ;;  %s1466_s6 = smov [#allocation3]  }
  0x34   : > { %p1270_p12 = scmp.ne.s32.totalorder %s1608_s2, %s1269_s5  ;;  %s1274_s7 = sshll.u32 %s1466_s6, 4  ;;  %s1275_s7 = int_to_ptr.vmem [resolvable:$false] %s1274_s7 }
  0x35   : > { %s1276_s10 = scalar_lea.vmem %s1275_s7, 1024  ;;  %p1277_p6 = scmp.lt.s32.totalorder %s1608_s2, %s1275_s7 }
  0x36   : > { %p1272_p0 = pnand %p1270_p12, %p1256_p13  ;;  %p1278_p3 = scmp.lt.s32.totalorder %s1276_s10, %s1269_s5 }
  0x38   : > { %p1273_p5 = pneg %p1272_p0  ;;  %p1279_p4 = por %p1278_p3, %p1277_p6 }
  0x3a   : > { %p1280_p8 = pnand %p1279_p4, %p1273_p5 }
  0x3c   : > { %1283 = shalt.err (!%p1280_p8)
}
  0x3d   : > { %s1912_s11 = smov 128   ;;  %s1468_s1 = smov 64  }
  0x3e   : > { %s1469_s3 = smov 4   ;;  %s1929_s21 = sld [smem:[#allocation12_spill]] }
  0x3f   : > { %1034 = dma.hbm_to_vmem [thread:$0]  (!%p1614_p10), %s1606_s12, 512, %s1608_s2, %s1619_s22, %s1912_s11, %s1468_s1, %s1469_s3  }
  0x40   : > { %p199_p2 = scmp.lt.s32.totalorder %s1464_s25, 7  ;;  %s944_s30 = sadd.s32 4294967295, %s1464_s25  }
  0x41   : > { %s945_s4 = sadd.s32 4294967294, %s1464_s25   ;;  %p57_p6 = scmp.eq.s32.totalorder %s944_s30, 0 }
  0x42   : > { %p1651_p5 = pnand %p956_p11, %p199_p2  ;;  %s69_s5 = sadd.s32 1, %s1432_s17 }
  0x43   : > { %p1931_p7 = scmp.eq.s32.totalorder %s1576_s29, 0  ;;  %p1932_p13 = scmp.ne.s32.totalorder %s1440_s19, %s1436_s18 }
  0x44   : > { %p76_p10 = scmp.ne.s32.totalorder %s1432_s17, %s1428_s16  ;;  %p82_p11 = scmp.ne.s32.totalorder %s1428_s16, %s1424_s15 }
  0x45   : > { %s1661_s6 = scalar_select %p1931_p7, %s1432_s17, %s69_s5  }
  0x46   : > { %p1666_p1 = por %p57_p6, %p1932_p13  ;;  %p126_p9 = scmp.ne.s32.totalorder %s1420_s14, %s1416_s13 }
  0x47   : > { %p1934_p12 = scmp.eq.s32.totalorder %s1464_s25, 0  ;;  %p127_p3 = scmp.eq.s32.totalorder %s944_s30, 5 }
  0x48   : > { %s1933_s28 = scalar_select %p1666_p1, 1, 0 }
  0x49   : > { %p78_p0 = por %p76_p10, %p1934_p12  ;;  %p1678_p4 = por %p82_p11, %p57_p6 }
  0x4a   : > { %p132_p8 = scmp.ne.s32.totalorder %s1416_s13, %s1929_s21  ;;  %p1684_p2 = por %p127_p3, %p126_p9 }
  0x4b   : > { %s1935_s2 = scalar_select %p1678_p4, 1, 0 }
  0x4c   : > { %s1936_s12 = scalar_select %p1684_p2, 1, 0 }
  0x4d   : > { %p133_p7 = scmp.eq.s32.totalorder %s945_s4, 5  ;;  %s179_s18 = sand.u32 1, %s1432_s17  }
  0x4e   : > { %s1007_s29 = sshll.u32 %s1456_s23, 11  ;;  %s952_s15 = sshll.u32 %s179_s18, 7 }
  0x4f   : > { %p1690_p13 = por %p133_p7, %p132_p8  ;;  %s1938_s1 = sld [smem:[#allocation18_spill]] }
  0x50   : > { %p1939_p6 = scmp.lt.s32.totalorder %s1464_s25, 6  ;;  %s183_s30 = scalar_lea.vmem [#allocation6], %s952_s15 }
  0x51   : > { %s1937_s22 = scalar_select %p1690_p13, 1, 0 }
  0x52   : > { %p1701_p10 = pnand %p1939_p6, %p78_p0  ;;  %s191_s4 = sshll.u32 %s183_s30, 4  ;;  %s1705_s4 = int_to_ptr.vmem [resolvable:$true] %s191_s4 }
  0x53   : > { %s1707_s5 = scalar_lea.sflag [#allocation7], %s179_s18 }
  0x54   : > { %p1286_p9 = pneg %p1701_p10 }
  0x55   : > { %s1697_s3 = scalar_lea.hbm %s1938_s1, %s1007_s29  ;;  %s1289_s11 = scalar_lea.hbm %s1938_s1, 4096 }
  0x56   : > { %s1284_s7 = scalar_lea.hbm %s1697_s3, 2048  ;;  %p1290_p0 = scmp.lt.u32.totalorder %s1697_s3, %s1938_s1 }
  0x57   : > { %p1285_p11 = scmp.ne.s32.totalorder %s1697_s3, %s1284_s7  ;;  %p1291_p8 = scmp.lt.u32.totalorder %s1289_s11, %s1284_s7 }
  0x58   : > { %p1293_p6 = scmp.lt.u32.totalorder %s1284_s7, %s1697_s3 }
  0x59   : > { %p1287_p12 = pnand %p1286_p9, %p1285_p11  ;;  %p1292_p7 = por %p1291_p8, %p1290_p0 }
  0x5b   : > { %p1288_p3 = pneg %p1287_p12  ;;  %p1294_p13 = por %p1293_p6, %p1292_p7 }
  0x5d   : > { %p1295_p2 = pnand %p1294_p13, %p1288_p3 }
  0x5f   : > { %1298 = shalt.err (!%p1295_p2)
}
  0x60   : > { %s1299_s18 = scalar_lea.vmem %s1705_s4, 2048  ;;  %s1470_s15 = smov [#allocation6]  }
  0x61   : > { %p1300_p11 = scmp.ne.s32.totalorder %s1705_s4, %s1299_s18  ;;  %s1304_s30 = sshll.u32 %s1470_s15, 4  ;;  %s1305_s30 = int_to_ptr.vmem [resolvable:$false] %s1304_s30 }
  0x62   : > { %s1306_s0 = scalar_lea.vmem %s1305_s30, 4096  ;;  %p1307_p1 = scmp.lt.s32.totalorder %s1705_s4, %s1305_s30 }
  0x63   : > { %p1302_p12 = pnand %p1300_p11, %p1286_p9  ;;  %p1308_p0 = scmp.lt.s32.totalorder %s1306_s0, %s1299_s18 }
  0x65   : > { %p1303_p4 = pneg %p1302_p12  ;;  %p1309_p8 = por %p1308_p0, %p1307_p1 }
  0x67   : > { %p1310_p7 = pnand %p1309_p8, %p1303_p4 }
  0x69   : > { %1313 = shalt.err (!%p1310_p7)
}
  0x6a   : > { %s1471_s27 = smov 8   ;;  %s1941_s11 = smov 128  }
  0x6b   : > { %1037 = dma.hbm_to_vmem [thread:$0]  (!%p1701_p10), %s1697_s3, 2048, %s1705_s4, %s1707_s5, %s1941_s11, %s1941_s11, %s1471_s27  }
  0x6c   : > { %203 = sbr.rel (%p1651_p5) target bundleno = 526 (0x20e), region = 32  ;;  %s205_s7 = sand.u32 (!%p1651_p5), 1, %s1440_s19  }
  0x6d   : > { %s957_s29 = sshll.u32 (!%p1651_p5), %s205_s7, 5  ;;  %s206_s10 = scalar_lea.sflag (!%p1651_p5), [#allocation4], %s205_s7 }
  0x6e   : > { %s1740_s18 = scalar_lea.vmem (!%p1651_p5), [#allocation3], %s957_s29  ;;  %p1942_p1 = scmp.ne.s32.totalorder (!%p1651_p5), %s1933_s28, 0 }
  0x73   : > { %1399 = dma.done.wait (%p1942_p1), %s206_s10, 512  }
  0x74   : > { %1401 = vsyncadd (%p1942_p1), %s206_s10, 4294966784  ;;  %s214_s21 = sand.u32 1, %s1428_s16   ;;  %p1943_p5 = scmp.ne.s32.totalorder %s1935_s2, 0 }
  0x75   : > { %s958_s15 = sshll.u32 %s214_s21, 7  ;;  %s215_s3 = scalar_lea.sflag [#allocation7], %s214_s21 }
  0x76   : > { %s1747_s4 = scalar_lea.vmem [#allocation6], %s958_s15 }
  0x77   : > { %1403 = dma.done.wait (%p1943_p5), %s215_s3, 2048  }
  0x78   : > { %1405 = vsyncadd (%p1943_p5), %s215_s3, 4294965248  ;;  %s243_s26 = sand.u32 1, %s1416_s13   ;;  %s1944_s28 = sld [smem:[#allocation13_spill]] }
  0x79   : > { %s959_s5 = sshll.u32 %s243_s26, 4 }
  0x7a   : > { %s1756_s30 = scalar_lea.vmem [#allocation8], %s959_s5 }
  0x7e   : > { %p960_p4 = scmp.ne.s32.totalorder %s1944_s28, 0 }
  0x7f   : > { %v1472_v0 = vmov (!%p960_p4), 0.0  }
  0x80   : > { %252 = sbr.rel (%p960_p4) target bundleno = 136 (0x88), region = 44  ;;  %253 = vst [vmem:[#allocation2] sm:$0xff] (!%p960_p4), %v1472_v0  ;;  %254 = vst [vmem:[#allocation2 + $0x8] sm:$0xff] (!%p960_p4), %v1472_v0 }
  0x81   : > { %255 = vst [vmem:[#allocation2 + $0x10] sm:$0xff] (!%p960_p4), %v1472_v0  ;;  %256 = vst [vmem:[#allocation2 + $0x18] sm:$0xff] (!%p960_p4), %v1472_v0 }
  0x82   : > { %257 = vst [vmem:[#allocation2 + $0x20] sm:$0xff] (!%p960_p4), %v1472_v0  ;;  %258 = vst [vmem:[#allocation2 + $0x28] sm:$0xff] (!%p960_p4), %v1472_v0 }
  0x83   : > { %259 = vst [vmem:[#allocation2 + $0x30] sm:$0xff] (!%p960_p4), %v1472_v0  ;;  %260 = vst [vmem:[#allocation2 + $0x38] sm:$0xff] (!%p960_p4), %v1472_v0 }
  0x84   : > { %261 = vst [vmem:[#allocation2 + $0x40] sm:$0xff] (!%p960_p4), %v1472_v0  ;;  %262 = vst [vmem:[#allocation2 + $0x48] sm:$0xff] (!%p960_p4), %v1472_v0 }
  0x85   : > { %263 = vst [vmem:[#allocation2 + $0x50] sm:$0xff] (!%p960_p4), %v1472_v0  ;;  %264 = vst [vmem:[#allocation2 + $0x58] sm:$0xff] (!%p960_p4), %v1472_v0 }
  0x86   : > { %265 = vst [vmem:[#allocation2 + $0x60] sm:$0xff] (!%p960_p4), %v1472_v0  ;;  %266 = vst [vmem:[#allocation2 + $0x68] sm:$0xff] (!%p960_p4), %v1472_v0 }
  0x87   : > { %267 = vst [vmem:[#allocation2 + $0x70] sm:$0xff] %v1472_v0  ;;  %268 = vst [vmem:[#allocation2 + $0x78] sm:$0xff] %v1472_v0 }
  0x88 PF: > { %v1162_v1 = vld [vmem:[%s1747_s4 + $0x4] ss:$8 sps:$4 sm:$0xff]   ;;  %v1164_v2 = vld [vmem:[%s1747_s4] ss:$8 sps:$4 sm:$0xff]   ;;  %v1473_v3 = vmov 0   ;;  %v1187_v19 = vld [vmem:[%s1740_s18 + $0x10] sm:$0xff]  }
  0x89   : > { %445 = vmatprep.mubr.bf16.mxu0 %v1473_v3  ;;  %465 = vmatprep.mubr.bf16.mxu1 %v1473_v3  ;;  %v1165_v4 = vld [vmem:[%s1747_s4 + $0x14] ss:$8 sps:$4 sm:$0xff]   ;;  %v1167_v5 = vld [vmem:[%s1747_s4 + $0x10] ss:$8 sps:$4 sm:$0xff]   ;;  %v1168_v6 = vld [vmem:[%s1747_s4 + $0x24] ss:$8 sps:$4 sm:$0xff]  }
  0x8a   : > { %413 = vmatprep.subr.bf16.mxu0 %v1162_v1  ;;  %1009 = vmatprep.subr.bf16.mxu1 %v1162_v1  ;;  %v1170_v7 = vld [vmem:[%s1747_s4 + $0x20] ss:$8 sps:$4 sm:$0xff]   ;;  %v1171_v8 = vld [vmem:[%s1747_s4 + $0x34] ss:$8 sps:$4 sm:$0xff]   ;;  %v1173_v9 = vld [vmem:[%s1747_s4 + $0x30] ss:$8 sps:$4 sm:$0xff]  }
  0x8b   : > { %414 = vmatpush1.bf16.msra.mxu0 %v1164_v2  ;;  %1017 = vmatpush1.bf16.msra.mxu1 %v1164_v2  ;;  %v1174_v10 = vld [vmem:[%s1747_s4 + $0x44] ss:$8 sps:$4 sm:$0xff]   ;;  %v1176_v11 = vld [vmem:[%s1747_s4 + $0x40] ss:$8 sps:$4 sm:$0xff]   ;;  %v1177_v12 = vld [vmem:[%s1747_s4 + $0x54] ss:$8 sps:$4 sm:$0xff]  }
  0x8c   : > { %415 = vmatprep.subr.bf16.mxu0 %v1165_v4  ;;  %1010 = vmatprep.subr.bf16.mxu1 %v1165_v4  ;;  %v1179_v13 = vld [vmem:[%s1747_s4 + $0x50] ss:$8 sps:$4 sm:$0xff]   ;;  %v1180_v14 = vld [vmem:[%s1747_s4 + $0x64] ss:$8 sps:$4 sm:$0xff]   ;;  %v1182_v15 = vld [vmem:[%s1747_s4 + $0x60] ss:$8 sps:$4 sm:$0xff]  }
  0x8d   : > { %v1183_v16 = vld [vmem:[%s1747_s4 + $0x74] ss:$8 sps:$4 sm:$0xff]   ;;  %v1185_v17 = vld [vmem:[%s1747_s4 + $0x70] ss:$8 sps:$4 sm:$0xff]   ;;  %v1186_v18 = vld [vmem:[%s1740_s18] sm:$0xff]   ;;  %s1945_s2 = sld [smem:[#allocation13_spill]] }
  0x8e   : > { %v1188_v20 = vld [vmem:[%s1740_s18 + $0x8] sm:$0xff]   ;;  %v1189_v21 = vld [vmem:[%s1740_s18 + $0x18] sm:$0xff]   ;;  %v269_v22 = vld [vmem:[#allocation2] sm:$0xff] }
  0x8f   : > { %416 = vmatpush1.bf16.msra.mxu0 %v1167_v5  ;;  %1018 = vmatpush1.bf16.msra.mxu1 %v1167_v5  ;;  %v277_v23 = vld [vmem:[#allocation2 + $0x40] sm:$0xff]  ;;  %v270_v24 = vld [vmem:[#allocation2 + $0x8] sm:$0xff]  ;;  %v271_v28 = vld [vmem:[#allocation2 + $0x10] sm:$0xff] }
  0x90   : > { %417 = vmatprep.subr.bf16.mxu0 %v1168_v6  ;;  %1011 = vmatprep.subr.bf16.mxu1 %v1168_v6  ;;  %v278_v25 = vld [vmem:[#allocation2 + $0x48] sm:$0xff]  ;;  %v279_v29 = vld [vmem:[#allocation2 + $0x50] sm:$0xff]  ;;  %v272_v34 = vld [vmem:[#allocation2 + $0x18] sm:$0xff] }
  0x91   : > { %v280_v35 = vld [vmem:[#allocation2 + $0x58] sm:$0xff]  ;;  %v273_v46 = vld [vmem:[#allocation2 + $0x20] sm:$0xff]  ;;  %v274_v48 = vld [vmem:[#allocation2 + $0x28] sm:$0xff] }
  0x92   : > { %v281_v47 = vld [vmem:[#allocation2 + $0x60] sm:$0xff]  ;;  %v282_v49 = vld [vmem:[#allocation2 + $0x68] sm:$0xff]  ;;  %v275_v52 = vld [vmem:[#allocation2 + $0x30] sm:$0xff] }
  0x93   : > { %418 = vmatpush1.bf16.msra.mxu0 %v1170_v7  ;;  %1019 = vmatpush1.bf16.msra.mxu1 %v1170_v7  ;;  %v283_v53 = vld [vmem:[#allocation2 + $0x70] sm:$0xff]  ;;  %v276_v58 = vld [vmem:[#allocation2 + $0x38] sm:$0xff]  ;;  %p981_p2 = scmp.ne.s32.totalorder %s1945_s2, 1 }
  0x94   : > { %419 = vmatprep.subr.bf16.mxu0 %v1171_v8  ;;  %1012 = vmatprep.subr.bf16.mxu1 %v1171_v8  ;;  %v284_v59 = vld [vmem:[#allocation2 + $0x78] sm:$0xff]  ;;  %v540_v6 = vlaneseq (!%p981_p2)  ;;  %s1946_s11 = sld [smem:[#allocation19_spill]] (!%p981_p2)  ;;  %s1947_s7 = sld [smem:[#allocation14_spill]] (!%p981_p2) }
  0x96   : > { %v541_v7 = vshrl.u32 (!%p981_p2), %v540_v6, 7 }
  0x97   : > { %420 = vmatpush1.bf16.msra.mxu0 %v1173_v9  ;;  %1020 = vmatpush1.bf16.msra.mxu1 %v1173_v9 }
  0x98   : > { %421 = vmatprep.subr.bf16.mxu0 %v1174_v10  ;;  %1013 = vmatprep.subr.bf16.mxu1 %v1174_v10  ;;  %v542_v9 = vsub.s32 (!%p981_p2), 0, %v541_v7  ;;  %v546_v10 = vsub.s32 (!%p981_p2), 1, %v541_v7 }
  0x9a   : > { %p998_p13 = scmp.ne.s32.totalorder (!%p981_p2), %s1947_s7, 2 }
  0x9b   : > { %422 = vmatpush1.bf16.msra.mxu0 %v1176_v11  ;;  %1021 = vmatpush1.bf16.msra.mxu1 %v1176_v11 }
  0x9c   : > { %423 = vmatprep.subr.bf16.mxu0 %v1177_v12  ;;  %1014 = vmatprep.subr.bf16.mxu1 %v1177_v12 }
  0x9f   : > { %424 = vmatpush1.bf16.msra.mxu0 %v1179_v13  ;;  %1022 = vmatpush1.bf16.msra.mxu1 %v1179_v13  ;;  %v538_v13 = vld [vmem:[%s1946_s11] sm:$0x3] (!%p981_p2) }
  0xa0   : > { %425 = vmatprep.subr.bf16.mxu0 %v1180_v14  ;;  %1015 = vmatprep.subr.bf16.mxu1 %v1180_v14 }
  0xa3   : > { %426 = vmatpush1.bf16.msra.mxu0 %v1182_v15  ;;  %1023 = vmatpush1.bf16.msra.mxu1 %v1182_v15  ;;  %v543_v15 = vrot.slane (!%p981_p2), %v538_v13, %v542_v9 }
  0xa4   : > { %427 = vmatprep.subr.bf16.mxu0 %v1183_v16  ;;  %1016 = vmatprep.subr.bf16.mxu1 %v1183_v16  ;;  %v547_v16 = vrot.slane (!%p981_p2), %v538_v13, %v546_v10 }
  0xa7   : > { %428 = vmatpush1.bf16.msra.mxu0 %v1185_v17  ;;  %1024 = vmatpush1.bf16.msra.mxu1 %v1185_v17 }
  0xaa   : > { %446 = vmatmul.mubr.bf16.vlgmr.msra.gmra.mrb[0].mxu0 %v1186_v18  ;;  %466 = vmatmul.mubr.bf16.vlgmr.msra.gmra.mrb[0].mxu1 %v1187_v19 }
  0xab   : > { %455 = vmatprep.mubr.bf16.mxu0 %v1473_v3  ;;  %475 = vmatprep.mubr.bf16.mxu1 %v1473_v3 }
  0xb2   : > { %456 = vmatmul.mubr.bf16.gmra.mrb[4].mxu0 %v1188_v20  ;;  %476 = vmatmul.mubr.bf16.gmra.mrb[4].mxu1 %v1189_v21 }
 0x17d   : > { %v447_v26 = vpop.f32.mrb[0].mxu0  ;;  %v467_v27 = vpop.f32.mrb[0].mxu1 }
 0x17e   : > { %v486_v30 = vadd.f32 %v447_v26, %v269_v22  ;;  %v494_v31 = vadd.f32 %v467_v27, %v277_v23  ;;  %v449_v32 = vpop.f32.mrb[1].mxu0  ;;  %v469_v33 = vpop.f32.mrb[1].mxu1 }
 0x17f   : > { %v487_v36 = vadd.f32 %v449_v32, %v270_v24  ;;  %v495_v37 = vadd.f32 %v469_v33, %v278_v25  ;;  %v451_v38 = vpop.f32.mrb[2].mxu0  ;;  %v471_v39 = vpop.f32.mrb[2].mxu1 }
 0x180   : > { %502 = vst [vmem:[#allocation2] sm:$0xff] %v486_v30  ;;  %510 = vst [vmem:[#allocation2 + $0x40] sm:$0xff] %v494_v31  ;;  %v488_v40 = vadd.f32 %v451_v38, %v271_v28  ;;  %v496_v41 = vadd.f32 %v471_v39, %v279_v29  ;;  %v453_v42 = vpop.f32.mrb[3].mxu0  ;;  %v473_v43 = vpop.f32.mrb[3].mxu1 }
 0x181   : > { %503 = vst [vmem:[#allocation2 + $0x8] sm:$0xff] %v487_v36  ;;  %511 = vst [vmem:[#allocation2 + $0x48] sm:$0xff] %v495_v37  ;;  %v489_v44 = vadd.f32 %v453_v42, %v272_v34  ;;  %v497_v45 = vadd.f32 %v473_v43, %v280_v35 }
 0x182   : > { %504 = vst [vmem:[#allocation2 + $0x10] sm:$0xff] %v488_v40  ;;  %512 = vst [vmem:[#allocation2 + $0x50] sm:$0xff] %v496_v41 }
 0x183   : > { %505 = vst [vmem:[#allocation2 + $0x18] sm:$0xff] %v489_v44  ;;  %513 = vst [vmem:[#allocation2 + $0x58] sm:$0xff] %v497_v45 }
 0x185   : > { %v457_v50 = vpop.f32.mrb[4].mxu0  ;;  %v477_v51 = vpop.f32.mrb[4].mxu1  ;;  %521 = sbr.rel (%p981_p2) target bundleno = 499 (0x1f3), region = 48 }
 0x186   : > { %v490_v54 = vadd.f32 %v457_v50, %v273_v46  ;;  %v498_v55 = vadd.f32 %v477_v51, %v281_v47  ;;  %v459_v56 = vpop.f32.mrb[5].mxu0  ;;  %v479_v57 = vpop.f32.mrb[5].mxu1 }
 0x187   : > { %v491_v60 = vadd.f32 %v459_v56, %v274_v48  ;;  %v499_v61 = vadd.f32 %v479_v57, %v282_v49  ;;  %v461_v62 = vpop.f32.mrb[6].mxu0  ;;  %v481_v63 = vpop.f32.mrb[6].mxu1  ;;  %v522_v8 = vld [vmem:[#allocation2] sm:$0xff] (!%p981_p2) }
 0x188   : > { %506 = vst [vmem:[#allocation2 + $0x20] sm:$0xff] %v490_v54  ;;  %514 = vst [vmem:[#allocation2 + $0x60] sm:$0xff] %v498_v55  ;;  %v492_v0 = vadd.f32 %v461_v62, %v275_v52  ;;  %v500_v1 = vadd.f32 %v481_v63, %v283_v53  ;;  %v463_v2 = vpop.f32.mrb[7].mxu0  ;;  %v483_v3 = vpop.f32.mrb[7].mxu1  ;;  %v523_v11 = vld [vmem:[#allocation2 + $0x8] sm:$0xff] (!%p981_p2)  ;;  %v550_v19 = vadd.f32 (!%p981_p2), %v543_v15, %v522_v8  ;;  %v530_v26 = vld [vmem:[#allocation2 + $0x40] sm:$0xff] (!%p981_p2) }
 0x189   : > { %507 = vst [vmem:[#allocation2 + $0x28] sm:$0xff] %v491_v60  ;;  %515 = vst [vmem:[#allocation2 + $0x68] sm:$0xff] %v499_v61  ;;  %v493_v4 = vadd.f32 %v463_v2, %v276_v58  ;;  %v501_v5 = vadd.f32 %v483_v3, %v284_v59  ;;  %v524_v12 = vld [vmem:[#allocation2 + $0x10] sm:$0xff] (!%p981_p2)  ;;  %v551_v20 = vadd.f32 (!%p981_p2), %v547_v16, %v523_v11  ;;  %v531_v27 = vld [vmem:[#allocation2 + $0x48] sm:$0xff] (!%p981_p2) }
 0x18a   : > { %508 = vst [vmem:[#allocation2 + $0x30] sm:$0xff] %v492_v0  ;;  %516 = vst [vmem:[#allocation2 + $0x70] sm:$0xff] %v500_v1  ;;  %v525_v14 = vld [vmem:[#allocation2 + $0x18] sm:$0xff] (!%p981_p2)  ;;  %v552_v21 = vadd.f32 (!%p981_p2), %v543_v15, %v524_v12  ;;  %v982_v30 = vmul.f32 (!%p981_p2), -1.442695, %v550_v19  ;;  %v532_v33 = vld [vmem:[#allocation2 + $0x50] sm:$0xff] (!%p981_p2)  ;;  %v558_v37 = vadd.f32 (!%p981_p2), %v543_v15, %v530_v26  ;;  %v559_v40 = vadd.f32 (!%p981_p2), %v547_v16, %v531_v27 }
 0x18b   : > { %509 = vst [vmem:[#allocation2 + $0x38] sm:$0xff] %v493_v4  ;;  %517 = vst [vmem:[#allocation2 + $0x78] sm:$0xff] %v501_v5  ;;  %v553_v23 = vadd.f32 (!%p981_p2), %v547_v16, %v525_v14  ;;  %v983_v31 = vmul.f32 (!%p981_p2), -1.442695, %v551_v20  ;;  %v533_v36 = vld [vmem:[#allocation2 + $0x58] sm:$0xff] (!%p981_p2)  ;;  %v560_v43 = vadd.f32 (!%p981_p2), %v543_v15, %v532_v33 }
 0x18c   : > { %v984_v32 = vmul.f32 -1.442695, %v552_v21  ;;  %1190 = vpow2.f32 %v982_v30  ;;  %v561_v46 = vadd.f32 %v547_v16, %v533_v36  ;;  %v990_v50 = vmul.f32 -1.442695, %v558_v37 }
 0x18d   : > { %v985_v35 = vmul.f32 -1.442695, %v553_v23  ;;  %1192 = vpow2.f32 %v983_v31  ;;  %v991_v52 = vmul.f32 -1.442695, %v559_v40  ;;  %v992_v54 = vmul.f32 -1.442695, %v560_v43 }
 0x18e   : > { %1194 = vpow2.f32 %v984_v32  ;;  %v993_v56 = vmul.f32 -1.442695, %v561_v46 }
 0x18f   : > { %v526_v17 = vld [vmem:[#allocation2 + $0x20] sm:$0xff]  ;;  %1196 = vpow2.f32 %v985_v35 }
 0x190   : > { %v527_v18 = vld [vmem:[#allocation2 + $0x28] sm:$0xff]  ;;  %v554_v25 = vadd.f32 %v543_v15, %v526_v17  ;;  %v534_v39 = vld [vmem:[#allocation2 + $0x60] sm:$0xff] }
 0x191   : > { %v528_v22 = vld [vmem:[#allocation2 + $0x30] sm:$0xff]  ;;  %v555_v28 = vadd.f32 %v547_v16, %v527_v18  ;;  %v535_v42 = vld [vmem:[#allocation2 + $0x68] sm:$0xff]  ;;  %v562_v49 = vadd.f32 %v543_v15, %v534_v39 }
 0x192   : > { %v529_v24 = vld [vmem:[#allocation2 + $0x38] sm:$0xff]  ;;  %v556_v29 = vadd.f32 %v543_v15, %v528_v22  ;;  %v986_v38 = vmul.f32 -1.442695, %v554_v25  ;;  %v536_v45 = vld [vmem:[#allocation2 + $0x70] sm:$0xff]  ;;  %v563_v51 = vadd.f32 %v547_v16, %v535_v42 }
 0x193   : > { %v557_v34 = vadd.f32 %v547_v16, %v529_v24  ;;  %v987_v41 = vmul.f32 -1.442695, %v555_v28  ;;  %v537_v48 = vld [vmem:[#allocation2 + $0x78] sm:$0xff]  ;;  %v564_v53 = vadd.f32 %v543_v15, %v536_v45  ;;  %v994_v57 = vmul.f32 -1.442695, %v562_v49 }
 0x194   : > { %v988_v44 = vmul.f32 -1.442695, %v556_v29  ;;  %1198 = vpow2.f32 %v986_v38  ;;  %v565_v55 = vadd.f32 %v547_v16, %v537_v48  ;;  %v995_v58 = vmul.f32 -1.442695, %v563_v51 }
 0x195   : > { %v989_v47 = vmul.f32 -1.442695, %v557_v34  ;;  %1200 = vpow2.f32 %v987_v41  ;;  %v996_v60 = vmul.f32 -1.442695, %v564_v53 }
 0x196   : > { %1202 = vpow2.f32 %v988_v44  ;;  %v1191_v59 = vpop.eup %1190  ;;  %v997_v62 = vmul.f32 -1.442695, %v565_v55 }
 0x197   : > { %1204 = vpow2.f32 %v989_v47  ;;  %v1193_v61 = vpop.eup %1192  ;;  %v614_v0 = vadd.f32 1.0, %v1191_v59 }
 0x198   : > { %1206 = vpow2.f32 %v990_v50  ;;  %v1195_v63 = vpop.eup %1194  ;;  %v615_v2 = vadd.f32 1.0, %v1193_v61 }
 0x199   : > { %1208 = vpow2.f32 %v991_v52  ;;  %v1197_v1 = vpop.eup %1196  ;;  %v616_v4 = vadd.f32 1.0, %v1195_v63 }
 0x19a   : > { %1210 = vpow2.f32 %v992_v54  ;;  %v617_v6 = vadd.f32 1.0, %v1197_v1 }
 0x19b   : > { %1212 = vpow2.f32 %v993_v56 }
 0x19c   : > { %1214 = vpow2.f32 %v994_v57 }
 0x19d   : > { %1216 = vpow2.f32 %v995_v58 }
 0x19e   : > { %v1199_v3 = vpop.eup %1198  ;;  %1218 = vpow2.f32 %v996_v60 }
 0x19f   : > { %v1201_v5 = vpop.eup %1200  ;;  %1220 = vpow2.f32 %v997_v62  ;;  %v618_v8 = vadd.f32 1.0, %v1199_v3 }
 0x1a0   : > { %v1203_v7 = vpop.eup %1202  ;;  %1222 = vrcp.f32 %v614_v0  ;;  %v619_v10 = vadd.f32 1.0, %v1201_v5 }
 0x1a1   : > { %v1205_v9 = vpop.eup %1204  ;;  %1224 = vrcp.f32 %v615_v2  ;;  %v620_v12 = vadd.f32 1.0, %v1203_v7 }
 0x1a2   : > { %v1207_v11 = vpop.eup %1206  ;;  %1226 = vrcp.f32 %v616_v4  ;;  %v621_v14 = vadd.f32 1.0, %v1205_v9 }
 0x1a3   : > { %v1209_v13 = vpop.eup %1208  ;;  %1228 = vrcp.f32 %v617_v6  ;;  %v622_v16 = vadd.f32 1.0, %v1207_v11 }
 0x1a4   : > { %v1211_v15 = vpop.eup %1210  ;;  %1230 = vrcp.f32 %v618_v8  ;;  %v623_v18 = vadd.f32 1.0, %v1209_v13 }
 0x1a5   : > { %v1213_v17 = vpop.eup %1212  ;;  %1232 = vrcp.f32 %v619_v10  ;;  %v624_v20 = vadd.f32 1.0, %v1211_v15 }
 0x1a6   : > { %v1215_v19 = vpop.eup %1214  ;;  %1234 = vrcp.f32 %v620_v12  ;;  %v625_v22 = vadd.f32 1.0, %v1213_v17 }
 0x1a7   : > { %v1217_v21 = vpop.eup %1216  ;;  %1236 = vrcp.f32 %v621_v14  ;;  %v626_v24 = vadd.f32 1.0, %v1215_v19 }
 0x1a8   : > { %v1219_v23 = vpop.eup %1218  ;;  %1238 = vrcp.f32 %v622_v16  ;;  %v627_v26 = vadd.f32 1.0, %v1217_v21 }
 0x1a9   : > { %v1221_v25 = vpop.eup %1220  ;;  %1240 = vrcp.f32 %v623_v18  ;;  %v628_v28 = vadd.f32 1.0, %v1219_v23 }
 0x1aa   : > { %v1223_v27 = vpop.eup %1222  ;;  %1242 = vrcp.f32 %v624_v20  ;;  %v629_v30 = vadd.f32 1.0, %v1221_v25 }
 0x1ab   : > { %v1225_v29 = vpop.eup %1224  ;;  %1244 = vrcp.f32 %v625_v22  ;;  %v662_v31 = vsub.f32 1.0, %v1223_v27 }
 0x1ac   : > { %v1227_v32 = vpop.eup %1226  ;;  %1246 = vrcp.f32 %v626_v24  ;;  %v663_v33 = vsub.f32 1.0, %v1225_v29 }
 0x1ad   : > { %v1229_v34 = vpop.eup %1228  ;;  %1248 = vrcp.f32 %v627_v26  ;;  %v664_v35 = vsub.f32 1.0, %v1227_v32  ;;  %v678_v36 = vmul.f32 %v1223_v27, %v662_v31 }
 0x1ae   : > { %v1231_v37 = vpop.eup %1230  ;;  %1250 = vrcp.f32 %v628_v28  ;;  %v665_v38 = vsub.f32 1.0, %v1229_v34  ;;  %v679_v39 = vmul.f32 %v1225_v29, %v663_v33 }
 0x1af   : > { %v1233_v40 = vpop.eup %1232  ;;  %1252 = vrcp.f32 %v629_v30  ;;  %v666_v41 = vsub.f32 1.0, %v1231_v37  ;;  %v680_v42 = vmul.f32 %v1227_v32, %v664_v35  ;;  %v1783_v43 = vmul.f32 %v678_v36, %v678_v36 }
 0x1b0   : > { %v1235_v44 = vpop.eup %1234  ;;  %v667_v45 = vsub.f32 1.0, %v1233_v40  ;;  %v681_v46 = vmul.f32 %v1229_v34, %v665_v38  ;;  %v1785_v47 = vmul.f32 %v679_v39, %v679_v39 }
 0x1b1   : > { %v1237_v48 = vpop.eup %1236  ;;  %v668_v49 = vsub.f32 1.0, %v1235_v44  ;;  %v682_v50 = vmul.f32 %v1231_v37, %v666_v41  ;;  %v1787_v51 = vmul.f32 %v680_v42, %v680_v42 }
 0x1b2   : > { %v1239_v52 = vpop.eup %1238  ;;  %v669_v53 = vsub.f32 1.0, %v1237_v48  ;;  %v683_v54 = vmul.f32 %v1233_v40, %v667_v45  ;;  %v1789_v55 = vmul.f32 %v681_v46, %v681_v46 }
 0x1b3   : > { %v1241_v56 = vpop.eup %1240  ;;  %v670_v57 = vsub.f32 1.0, %v1239_v52  ;;  %v684_v58 = vmul.f32 %v1235_v44, %v668_v49  ;;  %v1791_v59 = vmul.f32 %v682_v50, %v682_v50  ;;  %v763_v29 = vadd.f32 (!%p998_p13), %v1787_v51, %v1783_v43 }
 0x1b4   : > { %v1243_v60 = vpop.eup %1242  ;;  %v671_v61 = vsub.f32 1.0, %v1241_v56  ;;  %v685_v62 = vmul.f32 %v1237_v48, %v669_v53  ;;  %v1793_v63 = vmul.f32 %v683_v54, %v683_v54  ;;  %v776_v30 = vadd.f32 (!%p998_p13), %v1789_v55, %v1785_v47 }
 0x1b5   : > { %v1245_v0 = vpop.eup %1244  ;;  %v672_v1 = vsub.f32 1.0, %v1243_v60  ;;  %v686_v2 = vmul.f32 %v1239_v52, %v670_v57  ;;  %v1795_v3 = vmul.f32 %v684_v58, %v684_v58  ;;  %v764_v32 = vadd.f32 (!%p998_p13), %v763_v29, %v1791_v59 }
 0x1b6   : > { %v1247_v4 = vpop.eup %1246  ;;  %v673_v5 = vsub.f32 1.0, %v1245_v0  ;;  %v687_v6 = vmul.f32 %v1241_v56, %v671_v61  ;;  %v1797_v7 = vmul.f32 %v685_v62, %v685_v62  ;;  %v777_v34 = vadd.f32 (!%p998_p13), %v776_v30, %v1793_v63 }
 0x1b7   : > { %v1249_v8 = vpop.eup %1248  ;;  %v674_v9 = vsub.f32 1.0, %v1247_v4  ;;  %v688_v10 = vmul.f32 %v1243_v60, %v672_v1  ;;  %v1799_v11 = vmul.f32 %v686_v2, %v686_v2  ;;  %v765_v36 = vadd.f32 (!%p998_p13), %v764_v32, %v1795_v3 }
 0x1b8   : > { %v1251_v12 = vpop.eup %1250  ;;  %v675_v13 = vsub.f32 1.0, %v1249_v8  ;;  %v689_v14 = vmul.f32 %v1245_v0, %v673_v5  ;;  %v703_v15 = vmul.f32 %v687_v6, %v687_v6  ;;  %713 = sbr.rel (%p998_p13) target bundleno = 465 (0x1d1), region = 52  ;;  %v778_v38 = vadd.f32 (!%p998_p13), %v777_v34, %v1797_v7 }
 0x1b9   : > { %v1253_v16 = vpop.eup %1252  ;;  %v676_v17 = vsub.f32 1.0, %v1251_v12  ;;  %v690_v18 = vmul.f32 %v1247_v4, %v674_v9  ;;  %v704_v19 = vmul.f32 %v688_v10, %v688_v10  ;;  %v755_v31 = vmul.f32 (!%p998_p13), 0.0, %v1799_v11 }
 0x1ba   : > { %v677_v20 = vsub.f32 1.0, %v1253_v16  ;;  %v691_v21 = vmul.f32 %v1249_v8, %v675_v13  ;;  %v705_v22 = vmul.f32 %v689_v14, %v689_v14  ;;  %v756_v33 = vmul.f32 (!%p998_p13), 0.0, %v703_v15 }
 0x1bb   : > { %v692_v23 = vmul.f32 %v1251_v12, %v676_v17  ;;  %v706_v24 = vmul.f32 %v690_v18, %v690_v18  ;;  %v757_v35 = vmul.f32 (!%p998_p13), 0.0, %v704_v19  ;;  %v766_v40 = vadd.f32 (!%p998_p13), %v765_v36, %v755_v31 }
 0x1bc   : > { %v693_v25 = vmul.f32 %v1253_v16, %v677_v20  ;;  %v707_v26 = vmul.f32 %v691_v21, %v691_v21  ;;  %v758_v37 = vmul.f32 (!%p998_p13), 0.0, %v705_v22  ;;  %v779_v42 = vadd.f32 (!%p998_p13), %v778_v38, %v756_v33 }
 0x1bd   : > { %v708_v27 = vmul.f32 %v692_v23, %v692_v23  ;;  %v759_v39 = vmul.f32 (!%p998_p13), 0.0, %v706_v24  ;;  %v767_v45 = vadd.f32 (!%p998_p13), %v766_v40, %v757_v35 }
 0x1be   : > { %v709_v28 = vmul.f32 %v693_v25, %v693_v25  ;;  %v760_v41 = vmul.f32 (!%p998_p13), 0.0, %v707_v26  ;;  %v780_v48 = vadd.f32 (!%p998_p13), %v779_v42, %v758_v37 }
 0x1bf   : > { %v761_v44 = vmul.f32 0.0, %v708_v27  ;;  %v768_v49 = vadd.f32 %v767_v45, %v759_v39 }
 0x1c0   : > { %v762_v46 = vmul.f32 0.0, %v709_v28  ;;  %v781_v50 = vadd.f32 %v780_v48, %v760_v41 }
 0x1c1   : > { %v769_v52 = vadd.f32 %v768_v49, %v761_v44 }
 0x1c2   : > { %v782_v53 = vadd.f32 %v781_v50, %v762_v46 }
 0x1c3   : > { %v770_v54 = vrot.slane %v769_v52, 4 }
 0x1c4   : > { %v783_v56 = vrot.slane %v782_v53, 4 }
 0x1c5   : > { %v771_v57 = vadd.f32 %v770_v54, %v769_v52 }
 0x1c6   : > { %v784_v58 = vadd.f32 %v783_v56, %v782_v53 }
 0x1c7   : > { %v772_v60 = vrot.slane %v771_v57, 2 }
 0x1c8   : > { %v785_v61 = vrot.slane %v784_v58, 2 }
 0x1c9   : > { %v773_v62 = vadd.f32 %v772_v60, %v771_v57 }
 0x1ca   : > { %v786_v0 = vadd.f32 %v785_v61, %v784_v58 }
 0x1cb   : > { %v774_v1 = vrot.slane %v773_v62, 1 }
 0x1cc   : > { %v787_v2 = vrot.slane %v786_v0, 1 }
 0x1cd   : > { %v775_v4 = vadd.f32 %v774_v1, %v773_v62 }
 0x1ce   : > { %v788_v5 = vadd.f32 %v787_v2, %v786_v0 }
 0x1cf   : > { %789 = vst [vmem:[%s1756_s30] sm:$0xff] %v775_v4 }
 0x1d0   : > { %790 = vst [vmem:[%s1756_s30 + $0x8] sm:$0xff] %v788_v5 }
 0x1d1 PF: > { %s1948_s29 = sld [smem:[#allocation14_spill]] }
 0x1d7   : > { %p999_p10 = scmp.eq.s32.totalorder %s1948_s29, 2 }
 0x1d8   : > { %v795_v6 = vadd.f32 (!%p999_p10), %v1787_v51, %v1783_v43  ;;  %v808_v8 = vadd.f32 (!%p999_p10), %v1789_v55, %v1785_v47 }
 0x1d9   : > { %794 = sbr.rel (%p999_p10) target bundleno = 499 (0x1f3), region = 56 }
 0x1da   : > { %v796_v9 = vadd.f32 (!%p999_p10), %v795_v6, %v1791_v59  ;;  %v809_v10 = vadd.f32 (!%p999_p10), %v808_v8, %v1793_v63 }
 0x1dc   : > { %v797_v12 = vadd.f32 (!%p999_p10), %v796_v9, %v1795_v3  ;;  %v810_v13 = vadd.f32 (!%p999_p10), %v809_v10, %v1797_v7 }
 0x1de   : > { %v798_v14 = vadd.f32 (!%p999_p10), %v797_v12, %v1799_v11  ;;  %v811_v16 = vadd.f32 (!%p999_p10), %v810_v13, %v703_v15 }
 0x1e0   : > { %v799_v17 = vadd.f32 %v798_v14, %v704_v19  ;;  %v812_v18 = vadd.f32 %v811_v16, %v705_v22 }
 0x1e2   : > { %v800_v20 = vadd.f32 %v799_v17, %v706_v24  ;;  %v813_v21 = vadd.f32 %v812_v18, %v707_v26 }
 0x1e4   : > { %v801_v43 = vadd.f32 %v800_v20, %v708_v27  ;;  %v814_v51 = vadd.f32 %v813_v21, %v709_v28 }
 0x1e6   : > { %v802_v47 = vrot.slane %v801_v43, 4  ;;  %v815_v55 = vrot.slane %v814_v51, 4 }
 0x1e8   : > { %v803_v59 = vadd.f32 %v802_v47, %v801_v43  ;;  %v816_v23 = vadd.f32 %v815_v55, %v814_v51 }
 0x1ea   : > { %v804_v63 = vrot.slane %v803_v59, 2  ;;  %v817_v25 = vrot.slane %v816_v23, 2 }
 0x1ec   : > { %v805_v3 = vadd.f32 %v804_v63, %v803_v59  ;;  %v818_v29 = vadd.f32 %v817_v25, %v816_v23 }
 0x1ee   : > { %v806_v7 = vrot.slane %v805_v3, 1  ;;  %v819_v30 = vrot.slane %v818_v29, 1 }
 0x1f0   : > { %v807_v11 = vadd.f32 %v806_v7, %v805_v3  ;;  %v820_v15 = vadd.f32 %v819_v30, %v818_v29 }
 0x1f2   : > { %821 = vst [vmem:[%s1756_s30] sm:$0xff] %v807_v11  ;;  %822 = vst [vmem:[%s1756_s30 + $0x8] sm:$0xff] %v820_v15 }
 0x1f3 PF: > { %s1949_s10 = sld [smem:[#allocation14_spill]]  ;;  %s1950_s3 = sld [smem:[#allocation20_spill]] }
 0x1f4   : > { %s838_s5 = sshll.u32 %s1756_s30, 4  ;;  %s824_s28 = scalar_lea.sflag [#allocation5], %s243_s26  ;;  %s839_s5 = int_to_ptr.vmem [resolvable:$true] %s838_s5 }
 0x1f5   : > { %s1314_s2 = scalar_lea.vmem %s839_s5, 256  ;;  %p1951_p3 = scmp.ne.s32.totalorder %s1936_s12, 0 }
 0x1f6   : > { %p1315_p9 = scmp.ne.s32.totalorder %s839_s5, %s1314_s2  ;;  %s1474_s0 = smov [#allocation8]  }
 0x1f7   : > { %s1318_s27 = sshll.u32 %s1474_s0, 4  ;;  %s1319_s27 = int_to_ptr.vmem [resolvable:$false] %s1318_s27 }
 0x1f8   : > { %p1316_p6 = pnand %p1315_p9, %p1951_p3  ;;  %s1320_s11 = scalar_lea.vmem %s1319_s27, 512 }
 0x1f9   : > { %s1008_s18 = sshll.u32 %s1949_s10, 8  ;;  %p1321_p12 = scmp.lt.s32.totalorder %s839_s5, %s1319_s27 }
 0x1fa   : > { %s1829_s4 = scalar_lea.hbm %s1950_s3, %s1008_s18  ;;  %p1317_p11 = pneg %p1316_p6 }
 0x1fb   : > { %p1322_p0 = scmp.lt.s32.totalorder %s1320_s11, %s1314_s2 }
 0x1fd   : > { %p1323_p8 = por %p1322_p0, %p1321_p12 }
 0x1ff   : > { %p1324_p7 = pnand %p1323_p8, %p1317_p11 }
 0x201   : > { %1327 = shalt.err (!%p1324_p7)
}
 0x202   : > { %s1328_s26 = scalar_lea.hbm %s1829_s4, 256  ;;  %s1332_s29 = scalar_lea.hbm %s1950_s3, 768 }
 0x203   : > { %p1329_p1 = scmp.ne.s32.totalorder %s1829_s4, %s1328_s26  ;;  %p1333_p2 = scmp.lt.u32.totalorder %s1829_s4, %s1950_s3 }
 0x204   : > { %p1334_p13 = scmp.lt.u32.totalorder %s1332_s29, %s1328_s26  ;;  %p1336_p9 = scmp.lt.u32.totalorder %s1328_s26, %s1829_s4 }
 0x205   : > { %p1330_p5 = pnand %p1329_p1, %p1951_p3 }
 0x206   : > { %p1335_p10 = por %p1334_p13, %p1333_p2 }
 0x207   : > { %p1331_p4 = pneg %p1330_p5 }
 0x208   : > { %p1337_p6 = por %p1336_p9, %p1335_p10 }
 0x20a   : > { %p1338_p11 = pnand %p1337_p6, %p1331_p4 }
 0x20c   : > { %1341 = shalt.err (!%p1338_p11)
}
 0x20d   : > { %1029 = dma.vmem_to_hbm [thread:$0]  (%p1951_p3), %s839_s5, 256, %s1829_s4, %s824_s28  }
 0x20e PF: > { %s1952_s21 = sld [smem:[#allocation12_spill]]  ;;  %p1043_p12 = scmp.ge.s32.totalorder %s1464_s25, 2 }
 0x20f   : > { %p1953_p0 = scmp.ne.s32.totalorder %s1937_s22, 0 }
 0x211   : > { %p1039_p8 = pnand %p1043_p12, %p1953_p0 }
 0x214   : > { %s850_s15 = sand.u32 1, %s1952_s21  }
 0x215   : > { %s851_s2 = scalar_lea.sflag [#allocation5], %s850_s15 }
 0x216   : > { %1407 = dma.done.wait (!%p1039_p8), %s851_s2, 256  }
 0x217   : > { %1409 = vsyncadd (!%p1039_p8), %s851_s2, 4294967040  ;;  %s22_s25 = sadd.s32 1, %s1464_s25   ;;  %s1955_s4 = sld [smem:[#allocation15_spill]] }
 0x218   : > { %p1856_p7 = scmp.ge.s32.totalorder %s22_s25, 8   ;;  %s1956_s5 = sld [smem:[#allocation16_spill]] }
 0x219   : > { %s1957_s12 = smov %s1416_s13  ;;  %s1958_s13 = smov %s1420_s14 }
 0x21a   : > { %s1959_s14 = smov %s1596_s8  ;;  %s1960_s15 = smov %s1428_s16 }
 0x21b   : > { %s1961_s16 = smov %s1432_s17  ;;  %s1962_s17 = smov %s1661_s6 }
 0x21c   : > { %s1963_s18 = smov %s1440_s19  ;;  %s1964_s19 = smov %s1444_s20 }
 0x21d   : > { %s1965_s20 = smov %s1599_s9  ;;  %s1966_s21 = smov %s1456_s23 }
 0x21e   : > { %s1967_s22 = smov %s1460_s24  ;;  %s1968_s23 = smov %s1955_s4 }
 0x21f   : > { %s1969_s24 = smov %s1956_s5  ;;  %21 = sbr.rel (!%p1856_p7) target bundleno = 17 (0x11), region = 106 }
 0x226   :  { %856 = vsyncpa [#allocation4], 1 }
 0x227   :  { %858 = vsyncpa [#allocation4 + $0x1], 1 }
 0x228   :  { %859 = vsyncpa [#allocation7], 1 }
 0x229   :  { %861 = vsyncpa [#allocation7 + $0x1], 1 }
 0x22a   :  { %862 = vsyncpa [#allocation5], 1 }
 0x22b   :  { %864 = vsyncpa [#allocation5 + $0x1], 1 }

</bundles_post_ra>
